<compile_context>
chip_gen: v5e
topology: v5e:2x2
jax: 0.10.0
libtpu: 0.0.40
codegen_flags: <defaults>
</compile_context>

<pallas_src>
import functools

import jax
import jax.numpy as jnp
from jax import lax
from jax.experimental import pallas as pl
from jax.experimental.pallas import tpu as pltpu


_TARGET_TILE_BYTES = 4 * 1024 * 1024   # per-input, per-grid-step DMA volume
_VMEM_LIMIT_BYTES = 40 * 1024 * 1024   # 2 in x 2 bufs x 4 MiB + f32 acc + headroom
                                       # (fits v5e/v6e/v7x physical VMEM comfortably)


def _cdiv(a, b):
    return -(-a // b)


def _smooth_l1_kernel(x_ref, y_ref, out_ref, acc_ref, *, gq, tr, rows, need_mask):
    """Elementwise smooth-L1 accumulated in a resident VMEM scratch tile.

    x_ref, y_ref : (tr, lanes) input tiles.
    out_ref      : (1, 8, 128) per-parallel-block partial sum (scalar broadcast).
    acc_ref      : (tr, lanes) f32 VMEM scratch accumulator (persists across grid).
    """
    qi = pl.program_id(1)

    @pl.when(qi == 0)
    def _():
        acc_ref[...] = jnp.zeros_like(acc_ref)

    # Matches `(x - y).float()`: subtract in input dtype, then cast to f32.
    z = (x_ref[...] - y_ref[...]).astype(jnp.float32)
    az = jnp.abs(z)
    # Lean VALU body (~9 ops/elem): one select, constants folded.
    loss = jnp.where(az < 0.01, (0.5 * z) * z, 0.01 * az - 5e-5)

    if need_mask:
        # Mask rows past the logical end (partial / duplicated tail blocks).
        base = (pl.program_id(0) * gq + qi) * tr
        rid = lax.broadcasted_iota(jnp.int32, (tr, 1), 0) + base
        loss = jnp.where(rid < rows, loss, 0.0)

    acc_ref[...] += loss

    @pl.when(qi == pl.num_programs(1) - 1)
    def _():
        # One-time reduce (off the steady-state path): rows on the VPU, then lanes.
        col = jnp.sum(acc_ref[...], axis=0, keepdims=True)       # (1, lanes)
        out_ref[...] = jnp.broadcast_to(jnp.sum(col), out_ref.shape)


def smooth_l1_loss(x, y, size_average=True):
    assert x.shape == y.shape
    W = x.shape[-1]            # divisor of torch.mean(..., dim=-1)
    E = x.size                 # total element count
    R = E // W                 # number of "rows" for the final .mean()/.sum()

    # ---- Layout-free 2-D view (no pad, no relayout) ---------------------------
    # A row-major reshape that only regroups dims is a bitcast; pick the widest
    # lane dim that exactly divides E, else fall back to the natural last dim.
    lanes = W
    for cand in (512, 256, 128):
        if E % cand == 0:
            lanes = cand
            break
    rows = E // lanes
    x2 = x.reshape(rows, lanes)
    y2 = y.reshape(rows, lanes)

    itemsize = x.dtype.itemsize
    target_rows = max(32, _TARGET_TILE_BYTES // (lanes * itemsize))
    if rows <= target_rows:
        tr = rows                                   # block == full dim: always legal
    else:
        tr = max(32, (target_rows // 32) * 32)      # dtype-safe sublane multiple, tr <= rows

    nrb = _cdiv(rows, tr)                           # row blocks holding real data
    p = 2 if nrb >= 2 else 1                        # leading "parallel" axis (megacore/v7x)
    gq = _cdiv(nrb, p)
    need_mask = (p * gq * tr != rows)

    if p * gq == nrb:
        in_map = lambda pi, qi: (pi * gq + qi, 0)
    else:
        # Extra (fully masked) tail blocks re-read the last real block -> no OOB DMA.
        in_map = lambda pi, qi: (jnp.minimum(pi * gq + qi, nrb - 1), 0)

    kernel = functools.partial(
        _smooth_l1_kernel, gq=gq, tr=tr, rows=rows, need_mask=need_mask)

    cost = pl.CostEstimate(
        flops=9 * E,
        transcendentals=0,
        bytes_accessed=2 * E * itemsize + p * 8 * 128 * 4,
    )

    partials = pl.pallas_call(
        kernel,
        out_shape=jax.ShapeDtypeStruct((p, 8, 128), jnp.float32),
        grid_spec=pltpu.PrefetchScalarGridSpec(
            num_scalar_prefetch=0,
            grid=(p, gq),
            in_specs=[pl.BlockSpec((tr, lanes), in_map),
                      pl.BlockSpec((tr, lanes), in_map)],
            out_specs=pl.BlockSpec((1, 8, 128), lambda pi, qi: (pi, 0, 0)),
            scratch_shapes=[pltpu.VMEM((tr, lanes), jnp.float32)],
        ),
        compiler_params=pltpu.CompilerParams(
            dimension_semantics=("parallel", "arbitrary"),
            vmem_limit_bytes=_VMEM_LIMIT_BYTES,
        ),
        cost_estimate=cost,
    )(x2, y2)

    total = jnp.sum(partials[:, 0, 0]) / jnp.float32(W)   # == total_loss.sum()
    if size_average:
        return total / jnp.float32(R)                     # == total_loss.mean()
    return total


def _reference(x, y, size_average=True):
    """Pure-JAX reference mirroring the PyTorch module exactly."""
    z = (x - y).astype(jnp.float32)
    mse_mask = (jnp.abs(z) < 0.01).astype(jnp.float32)
    l1_mask = (jnp.abs(z) >= 0.01).astype(jnp.float32)
    mse = mse_mask * z
    l1 = l1_mask * z
    total = jnp.mean(0.5 * mse ** 2 * mse_mask, axis=-1)
    total = total + jnp.mean(0.01 * (jnp.abs(l1) - 0.005) * l1_mask, axis=-1)
    return jnp.mean(total) if size_average else jnp.sum(total)


if __name__ == "__main__":
    key = jax.random.PRNGKey(0)
    kx, ky = jax.random.split(key)

    # Small NCHW case; |x - y| straddles the 0.01 threshold. Single-block path.
    x = jax.random.normal(kx, (2, 4, 16, 16), dtype=jnp.float32) * 0.02
    y = jax.random.normal(ky, (2, 4, 16, 16), dtype=jnp.float32) * 0.02
    out_mean = jax.block_until_ready(smooth_l1_loss(x, y, size_average=True))
    out_sum = jax.block_until_ready(smooth_l1_loss(x, y, size_average=False))
    ref_mean = _reference(x, y, size_average=True)
    ref_sum = _reference(x, y, size_average=False)
    assert jnp.allclose(out_mean, ref_mean, rtol=1e-5, atol=1e-7), (out_mean, ref_mean)
    assert jnp.allclose(out_sum, ref_sum, rtol=1e-5, atol=1e-7), (out_sum, ref_sum)

    # Ragged W (E not divisible by 128) -> lanes = W fallback, still pad/copy free.
    kx1, ky1 = jax.random.split(jax.random.PRNGKey(1))
    x1 = jax.random.normal(kx1, (2, 3, 10, 7), dtype=jnp.float32) * 0.02
    y1 = jax.random.normal(ky1, (2, 3, 10, 7), dtype=jnp.float32) * 0.02
    out1 = jax.block_until_ready(smooth_l1_loss(x1, y1, size_average=False))
    ref1 = _reference(x1, y1, size_average=False)
    assert jnp.allclose(out1, ref1, rtol=1e-5, atol=1e-7), (out1, ref1)

    # Larger shape -> multi-block (parallel x arbitrary) grid + tail-row masking.
    kx2, ky2 = jax.random.split(jax.random.PRNGKey(2))
    x2 = jax.random.normal(kx2, (4, 8, 200, 256), dtype=jnp.float32) * 0.02
    y2 = jax.random.normal(ky2, (4, 8, 200, 256), dtype=jnp.float32) * 0.02
    out2 = jax.block_until_ready(smooth_l1_loss(x2, y2, size_average=True))
    ref2 = _reference(x2, y2, size_average=True)
    assert jnp.allclose(out2, ref2, rtol=1e-4, atol=1e-7), (out2, ref2)

    # Odd row-block count -> exercises the clamped duplicate-tail-block path.
    kx3, ky3 = jax.random.split(jax.random.PRNGKey(3))
    x3 = jax.random.normal(kx3, (5, 8, 250, 256), dtype=jnp.float32) * 0.02
    y3 = jax.random.normal(ky3, (5, 8, 250, 256), dtype=jnp.float32) * 0.02
    out3 = jax.block_until_ready(smooth_l1_loss(x3, y3, size_average=True))
    ref3 = _reference(x3, y3, size_average=True)
    assert jnp.allclose(out3, ref3, rtol=1e-4, atol=1e-7), (out3, ref3)

    print("KERNEL_OK")
</pallas_src>

<mosaic_0001>
module attributes {stable_mosaic.version = 11 : i64} {
  func.func @_smooth_l1_kernel(%arg0: i32, %arg1: i32, %arg2: memref<4x512xf32, #tpu.memory_space<vmem>>, %arg3: memref<4x512xf32, #tpu.memory_space<vmem>>, %arg4: memref<1x8x128xf32, #tpu.memory_space<vmem>>, %arg5: memref<4x512xf32, #tpu.memory_space<vmem>>) attributes {dimension_semantics = [#tpu.dimension_semantics<parallel>, #tpu.dimension_semantics<arbitrary>], iteration_bounds = array<i64: 1, 1>, scalar_prefetch = 0 : i64, scratch_operands = 1 : i64, tpu.core_type = #tpu.core_type<tc>, window_params = [{transform_indices = @transform_0, window_bounds = array<i64: 4, 512>}, {transform_indices = @transform_1, window_bounds = array<i64: 4, 512>}, {transform_indices = @transform_2, window_bounds = array<i64: 1, 8, 128>}]} {
    %c0_i32 = arith.constant 0 : i32
    %0 = arith.cmpi eq, %arg1, %c0_i32 : i32
    %1 = arith.extui %0 : i1 to i32
    %c0_i32_0 = arith.constant 0 : i32
    %2 = arith.cmpi ne, %1, %c0_i32_0 : i32
    scf.if %2 {
      %cst_13 = arith.constant 0.000000e+00 : f32
      %23 = vector.broadcast %cst_13 : f32 to vector<4x512xf32>
      %c0_14 = arith.constant 0 : index
      %c0_15 = arith.constant 0 : index
      %24 = vector.load %arg5[%c0_14, %c0_15] : memref<4x512xf32, #tpu.memory_space<vmem>>, vector<4x512xf32>
      tpu.vector_store %arg5[%c0_14, %c0_15], %23 {strides = array<i32>} : memref<4x512xf32, #tpu.memory_space<vmem>>, vector<4x512xf32>,
    } else {
    }
    %c0 = arith.constant 0 : index
    %c0_1 = arith.constant 0 : index
    %3 = vector.load %arg2[%c0, %c0_1] : memref<4x512xf32, #tpu.memory_space<vmem>>, vector<4x512xf32>
    %c0_2 = arith.constant 0 : index
    %c0_3 = arith.constant 0 : index
    %4 = vector.load %arg3[%c0_2, %c0_3] : memref<4x512xf32, #tpu.memory_space<vmem>>, vector<4x512xf32>
    %5 = arith.subf %3, %4 : vector<4x512xf32>
    %6 = math.absf %5 : vector<4x512xf32>
    %cst = arith.constant 0.00999999977 : f32
    %7 = vector.broadcast %cst : f32 to vector<4x512xf32>
    %8 = arith.cmpf olt, %6, %7 : vector<4x512xf32>
    %cst_4 = arith.constant 5.000000e-01 : f32
    %9 = vector.broadcast %cst_4 : f32 to vector<4x512xf32>
    %10 = arith.mulf %9, %5 : vector<4x512xf32>
    %11 = arith.mulf %10, %5 : vector<4x512xf32>
    %cst_5 = arith.constant 0.00999999977 : f32
    %12 = vector.broadcast %cst_5 : f32 to vector<4x512xf32>
    %13 = arith.mulf %12, %6 : vector<4x512xf32>
    %cst_6 = arith.constant 5.000000e-05 : f32
    %14 = vector.broadcast %cst_6 : f32 to vector<4x512xf32>
    %15 = arith.subf %13, %14 : vector<4x512xf32>
    %16 = arith.select %8, %11, %15 : vector<4x512xi1>, vector<4x512xf32>
    %c0_7 = arith.constant 0 : index
    %c0_8 = arith.constant 0 : index
    %17 = vector.load %arg5[%c0_7, %c0_8] : memref<4x512xf32, #tpu.memory_space<vmem>>, vector<4x512xf32>
    %18 = arith.addf %17, %16 : vector<4x512xf32>
    %c0_9 = arith.constant 0 : index
    %c0_10 = arith.constant 0 : index
    %19 = vector.load %arg5[%c0_9, %c0_10] : memref<4x512xf32, #tpu.memory_space<vmem>>, vector<4x512xf32>
    tpu.vector_store %arg5[%c0_9, %c0_10], %18 {strides = array<i32>} : memref<4x512xf32, #tpu.memory_space<vmem>>, vector<4x512xf32>,
    %c0_i32_11 = arith.constant 0 : i32
    %20 = arith.cmpi eq, %arg1, %c0_i32_11 : i32
    %21 = arith.extui %20 : i1 to i32
    %c0_i32_12 = arith.constant 0 : i32
    %22 = arith.cmpi ne, %21, %c0_i32_12 : i32
    scf.if %22 {
      %c0_13 = arith.constant 0 : index
      %c0_14 = arith.constant 0 : index
      %23 = vector.load %arg5[%c0_13, %c0_14] : memref<4x512xf32, #tpu.memory_space<vmem>>, vector<4x512xf32>
      %cst_15 = arith.constant dense<0.000000e+00> : vector<512xf32>
      %24 = vector.multi_reduction <add>, %23, %cst_15 [0] : vector<4x512xf32> to vector<512xf32>
      %25 = vector.shape_cast %24 : vector<512xf32> to vector<1x512xf32>
      %26 = vector.shape_cast %25 : vector<1x512xf32> to vector<1x1x512xf32>
      %cst_16 = arith.constant dense<0.000000e+00> : vector<1xf32>
      %27 = vector.multi_reduction <add>, %26, %cst_16 [1, 2] : vector<1x1x512xf32> to vector<1xf32>
      %28 = vector.shape_cast %27 : vector<1xf32> to vector<1x1x1xf32>
      %29 = vector.extract %28[0, 0, 0] : f32 from vector<1x1x1xf32>
      %30 = vector.broadcast %29 : f32 to vector<1x8x128xf32>
      %c0_17 = arith.constant 0 : index
      %c0_18 = arith.constant 0 : index
      %c0_19 = arith.constant 0 : index
      %31 = vector.load %arg4[%c0_17, %c0_18, %c0_19] : memref<1x8x128xf32, #tpu.memory_space<vmem>>, vector<1x8x128xf32>
      tpu.vector_store %arg4[%c0_17, %c0_18, %c0_19], %30 {strides = array<i32>} : memref<1x8x128xf32, #tpu.memory_space<vmem>>, vector<1x8x128xf32>,
    } else {
    }
    return
  }
  func.func @transform_0(%arg0: i32, %arg1: i32) -> (i32, i32) {
    %c1_i32 = arith.constant 1 : i32
    %0 = arith.muli %arg0, %c1_i32 : i32
    %1 = arith.addi %0, %arg1 : i32
    %c0_i32 = arith.constant 0 : i32
    %c0_i32_0 = arith.constant 0 : i32
    return %1, %c0_i32 : i32, i32
  }
  func.func @transform_1(%arg0: i32, %arg1: i32) -> (i32, i32) {
    %c1_i32 = arith.constant 1 : i32
    %0 = arith.muli %arg0, %c1_i32 : i32
    %1 = arith.addi %0, %arg1 : i32
    %c0_i32 = arith.constant 0 : i32
    %c0_i32_0 = arith.constant 0 : i32
    return %1, %c0_i32 : i32, i32
  }
  func.func @transform_2(%arg0: i32, %arg1: i32) -> (i32, i32, i32) {
    %c0_i32 = arith.constant 0 : i32
    %c0_i32_0 = arith.constant 0 : i32
    %c0_i32_1 = arith.constant 0 : i32
    return %arg0, %c0_i32, %c0_i32_0 : i32, i32, i32
  }
}

</mosaic_0001>

<bundles_post_ra>
// kernel: tpu_custom_call.1
= control target key start
LH: loop header
LB: loop body
LE: loop exit
PB: predicated region body
PF: predicated region fallthrough
CT: control target
= control target key end

     0   :  { %7 = vsyncpa [#allocation4], 0  ;;  %s278_s0 = inlined_call_operand.hbm [shape: f32[4,512], index: 0, kind: input, shape index: {}]   ;;  %s279_s1 = inlined_call_operand.hbm [shape: f32[4,512], index: 1, kind: input, shape index: {}]   ;;  %s280_s2 = inlined_call_operand.hbm [shape: f32[1,8,128], index: 2, kind: output, shape index: {}]  }
   0x1   :  { %8 = vsyncpa [#allocation7], 0 }
   0x2   :  { %9 = vsyncpa [#allocation5], 0  ;;  %s19_s11 = sshll.u32 %s278_s0, 4  ;;  %s251_s12 = smov [#allocation3]   ;;  %s20_s11 = int_to_ptr.hbm [resolvable:$true] %s19_s11 }
   0x3   :  { %s21_s13 = sshll.u32 %s251_s12, 4  ;;  %s34_s16 = sshll.u32 %s279_s1, 4  ;;  %s22_s13 = int_to_ptr.vmem [resolvable:$true] %s21_s13  ;;  %s35_s16 = int_to_ptr.hbm [resolvable:$true] %s34_s16 }
   0x4   :  { %24 = dma.hbm_to_vmem [thread:$0]  %s20_s11, 256, %s22_s13, [#allocation4]  }
   0x5   :  { %s252_s17 = smov [#allocation6]  }
   0x6   :  { %s36_s18 = sshll.u32 %s252_s17, 4  ;;  %s37_s18 = int_to_ptr.vmem [resolvable:$true] %s36_s18 }
   0x7   :  { %39 = dma.hbm_to_vmem [thread:$0]  %s35_s16, 256, %s37_s18, [#allocation7]  }
   0x8   :  { %245 = dma.done.wait [#allocation4], 256  }
   0x9   :  { %246 = vsyncadd [#allocation4], 4294967040 }
   0xa   :  { %247 = dma.done.wait [#allocation7], 256  }
   0xb   :  { %248 = vsyncadd [#allocation7], 4294967040  ;;  %v56_v0 = vld [vmem:[#allocation3] sm:$0xff]  ;;  %v57_v1 = vld [vmem:[#allocation3 + $0x8] sm:$0xff]  ;;  %vm100_vm2 = vcmask 1043456   ;;  %vm129_vm3 = vcmask 1040384  }
   0xc   :  { %v58_v2 = vld [vmem:[#allocation6] sm:$0xff]  ;;  %v59_v3 = vld [vmem:[#allocation6 + $0x8] sm:$0xff]  ;;  %s253_s0 = smov [#allocation8]   ;;  %s155_s21 = sshll.u32 %s280_s2, 4  ;;  %s156_s21 = int_to_ptr.hbm [resolvable:$true] %s155_s21 }
   0xd   :  { %v60_v4 = vsub.f32 %v56_v0, %v58_v2  ;;  %v61_v5 = vsub.f32 %v57_v1, %v59_v3  ;;  %s153_s1 = sshll.u32 %s253_s0, 4  ;;  %s154_s1 = int_to_ptr.vmem [resolvable:$true] %s153_s1 }
   0xf   :  { %v62_v6 = vand.u32 2147483647, %v60_v4  ;;  %v66_v7 = vmul.f32 0.5, %v60_v4  ;;  %v63_v8 = vand.u32 2147483647, %v61_v5  ;;  %v67_v9 = vmul.f32 0.5, %v61_v5 }
  0x11   :  { %v68_v10 = vmul.f32 %v66_v7, %v60_v4  ;;  %v70_v11 = vmul.f32 0.01, %v62_v6  ;;  %vm64_vm0 = vcmp.lt.f32.partialorder %v62_v6, 0.01  ;;  %v69_v12 = vmul.f32 %v67_v9, %v61_v5 }
  0x12   :  { %v71_v13 = vmul.f32 0.01, %v63_v8  ;;  %vm65_vm1 = vcmp.lt.f32.partialorder %v63_v8, 0.01 }
  0x13   :  { %v166_v14 = vadd.f32 -5e-05, %v70_v11 }
  0x14   :  { %v167_v15 = vadd.f32 -5e-05, %v71_v13 }
  0x15   :  { %v74_v16 = vsel %vm64_vm0, %v68_v10, %v166_v14 }
  0x16   :  { %v75_v17 = vsel %vm65_vm1, %v69_v12, %v167_v15  ;;  %89 = vst [vmem:[#allocation1] ss:$2 sm:$0xff] %v74_v16 }
  0x17   :  { %91 = vst [vmem:[#allocation1 + $0x10] ss:$2 sm:$0xff] %v75_v17 }
  0x1d   :  { %v92_v18 = vld.sshfl [vmem:[#allocation1] sm:$0xff pattern:$0x75316420]  ;;  %v93_v19 = vld.sshfl [vmem:[#allocation1 + $0x8] sm:$0xff pattern:$0x75316420] }
  0x1e   :  { %v94_v20 = vld.sshfl [vmem:[#allocation1 + $0x10] sm:$0xff pattern:$0x75316420]  ;;  %v95_v21 = vld.sshfl [vmem:[#allocation1 + $0x18] sm:$0xff pattern:$0x75316420] }
  0x1f   :  { %v101_v22 = vsel %vm100_vm2, %v92_v18, 0.0  ;;  %v108_v23 = vsel %vm100_vm2, %v93_v19, 0.0  ;;  %v115_v24 = vsel %vm100_vm2, %v94_v20, 0.0  ;;  %v122_v25 = vsel %vm100_vm2, %v95_v21, 0.0 }
  0x20   :  { %v102_v26 = vrot.slane %v101_v22, 4  ;;  %v109_v27 = vrot.slane %v108_v23, 4  ;;  %v116_v28 = vrot.slane %v115_v24, 4  ;;  %v123_v29 = vrot.slane %v122_v25, 4 }
  0x22   :  { %v103_v30 = vadd.f32 %v102_v26, %v101_v22  ;;  %v110_v31 = vadd.f32 %v109_v27, %v108_v23  ;;  %v117_v32 = vadd.f32 %v116_v28, %v115_v24  ;;  %v124_v33 = vadd.f32 %v123_v29, %v122_v25 }
  0x24   :  { %v104_v34 = vrot.slane %v103_v30, 2  ;;  %v111_v35 = vrot.slane %v110_v31, 2  ;;  %v118_v36 = vrot.slane %v117_v32, 2  ;;  %v125_v37 = vrot.slane %v124_v33, 2 }
  0x26   :  { %v105_v38 = vadd.f32 %v104_v34, %v103_v30  ;;  %v112_v39 = vadd.f32 %v111_v35, %v110_v31  ;;  %v119_v40 = vadd.f32 %v118_v36, %v117_v32  ;;  %v126_v41 = vadd.f32 %v125_v37, %v124_v33 }
  0x28   :  { %v106_v42 = vrot.slane %v105_v38, 1  ;;  %v113_v43 = vrot.slane %v112_v39, 1  ;;  %v120_v44 = vrot.slane %v119_v40, 1  ;;  %v127_v45 = vrot.slane %v126_v41, 1 }
  0x2a   :  { %v107_v46 = vadd.f32 %v106_v42, %v105_v38  ;;  %v114_v47 = vadd.f32 %v113_v43, %v112_v39  ;;  %v121_v48 = vadd.f32 %v120_v44, %v119_v40  ;;  %v128_v49 = vadd.f32 %v127_v45, %v126_v41 }
  0x2c   :  { %v130_v50 = vsel %vm129_vm3, %v107_v46, 0.0  ;;  %v131_v51 = vsel %vm129_vm3, %v114_v47, 0.0  ;;  %v133_v52 = vsel %vm129_vm3, %v121_v48, 0.0  ;;  %v135_v54 = vsel %vm129_vm3, %v128_v49, 0.0 }
  0x2d   :  { %v132_v53 = vadd.f32 %v131_v51, %v130_v50 }
  0x2f   :  { %v134_v55 = vadd.f32 %v133_v52, %v132_v53 }
  0x31   :  { %v136_v56 = vadd.f32 %v135_v54, %v134_v55 }
  0x33   :  { %137 = vadd.xlane.f32.xlu0 %v136_v56 }
  0xa6   :  { %v138_v57 = vpop.xlane.xlu0 %137 }
  0xa7   :  { %v139_v58 = vrot.slane %v138_v57, 4 }
  0xa9   :  { %v140_v59 = vadd.f32 %v139_v58, %v138_v57 }
  0xab   :  { %v141_v60 = vrot.slane %v140_v59, 2 }
  0xad   :  { %v142_v61 = vadd.f32 %v141_v60, %v140_v59 }
  0xaf   :  { %v143_v62 = vrot.slane %v142_v61, 1 }
  0xb1   :  { %v144_v63 = vadd.f32 %v143_v62, %v142_v61 }
  0xb3   :  { %168 = vpush %v144_v63 }
  0xe4   :  { %s169_s22 = spop %168 }
  0xe5   :  { %v146_v0 = vstv %s169_s22 }
  0xe6   :  { %147 = vst [vmem:[#allocation8] sm:$0xff] %v146_v0 }
  0xe7   :  { %158 = dma.vmem_to_hbm [thread:$0]  %s154_s1, 128, %s156_s21, [#allocation5]  }
  0xe8   :  { %249 = dma.done.wait [#allocation5], 128  }
  0xe9   :  { %250 = vsyncadd [#allocation5], 4294967168 }
  0xea   :  { %163 = vsyncpa [#allocation4], 1 }
  0xeb   :  { %164 = vsyncpa [#allocation7], 1 }
  0xec   :  { %165 = vsyncpa [#allocation5], 1 }

</bundles_post_ra>
